<compile_context>
chip_gen: v7x
topology: tpu7x:2x2x1
jax: 0.10.0
libtpu: 0.0.40
codegen_flags: <defaults>
</compile_context>

<pallas_src>
import functools

import jax
import jax.numpy as jnp
from jax import lax
from jax.experimental import pallas as pl
from jax.experimental.pallas import tpu as pltpu


def _rln_kernel(eps, x_ref, wb_ref, out_ref, mean_ref, std_ref):
    # x_ref: (C, HW)  -- one sample, lane-dense (leading batch dim squeezed).
    # wb_ref: (2, C, 1) -- packed [weight; bias].
    x = x_ref[...].astype(jnp.float32)
    inv_n = 1.0 / float(x.shape[0] * x.shape[1])   # trace-time Python float

    # Fused single-pass mean / variance from one read of the tile.
    s = jnp.sum(x)
    sq = jnp.sum(x * x)
    mean = s * inv_n
    var = jnp.maximum(sq * inv_n - mean * mean, 0.0)

    inv_std = lax.rsqrt(var + eps)        # EUP, otherwise-idle slot
    std = jnp.sqrt(var + eps)             # needed by the meta path

    w = wb_ref[0].astype(jnp.float32)     # (C, 1), broadcasts over lanes
    b = wb_ref[1].astype(jnp.float32)     # (C, 1)

    out_ref[...] = (((x - mean) * inv_std) * w + b).astype(out_ref.dtype)

    mean_ref[...] = jnp.full((1, 1), mean, dtype=mean_ref.dtype)
    std_ref[...] = jnp.full((1, 1), std, dtype=std_ref.dtype)


def rln_forward(x, weight, bias, meta1_w, meta1_b, meta2_w, meta2_b, eps=1e-5):
    """x: (N, C, H, W). weight/bias: (1, C, 1, 1).
    meta{1,2}_w: (C, 1, 1, 1) 1x1-conv weights, meta{1,2}_b: (C,) biases.
    Returns (out, rescale, rebias) matching the PyTorch module forward."""
    N, C, H, W = x.shape
    HW = H * W

    # Lane-dense view of x; pack weight/bias into one (2, C, 1) parameter slab.
    x2 = x.reshape(N, C, HW)
    wb = jnp.stack([weight.reshape(C, 1), bias.reshape(C, 1)], axis=0)

    grid_spec = pltpu.PrefetchScalarGridSpec(
        num_scalar_prefetch=0,
        grid=(N,),
        in_specs=[
            pl.BlockSpec((None, C, HW), lambda n: (n, 0, 0)),   # x (squeezed batch)
            pl.BlockSpec((2, C, 1), lambda n: (0, 0, 0)),       # packed weight/bias
        ],
        out_specs=[
            pl.BlockSpec((None, C, HW), lambda n: (n, 0, 0)),   # normalized output
            pl.BlockSpec((None, 1, 1), lambda n: (n, 0, 0)),    # per-sample mean
            pl.BlockSpec((None, 1, 1), lambda n: (n, 0, 0)),    # per-sample std
        ],
    )

    out2, mean, std = pl.pallas_call(
        functools.partial(_rln_kernel, float(eps)),
        out_shape=(
            jax.ShapeDtypeStruct((N, C, HW), x.dtype),
            jax.ShapeDtypeStruct((N, 1, 1), jnp.float32),
            jax.ShapeDtypeStruct((N, 1, 1), jnp.float32),
        ),
        grid_spec=grid_spec,
        compiler_params=pltpu.CompilerParams(
            dimension_semantics=("parallel",),
            vmem_limit_bytes=32 * 1024 * 1024,
        ),
    )(x2, wb)

    out = out2.reshape(N, C, H, W)

    # meta1/meta2: Conv2d(1, C, 1) on (N,1,1,1) tensors == per-channel scalar
    # affine. O(N*C) glue, fused by XLA; compute in f32 and cast to x.dtype to
    # preserve parity with the in-kernel casting convention.
    mean4 = mean.reshape(N, 1, 1, 1)
    std4 = std.reshape(N, 1, 1, 1)
    m1w = meta1_w.reshape(1, C, 1, 1).astype(jnp.float32)
    m1b = meta1_b.reshape(1, C, 1, 1).astype(jnp.float32)
    m2w = meta2_w.reshape(1, C, 1, 1).astype(jnp.float32)
    m2b = meta2_b.reshape(1, C, 1, 1).astype(jnp.float32)
    rescale = (m1w * std4 + m1b).astype(x.dtype)
    rebias = (m2w * mean4 + m2b).astype(x.dtype)
    return out, rescale, rebias


def _reference(x, weight, bias, m1w, m1b, m2w, m2b, eps=1e-5):
    mean = jnp.mean(x, axis=(1, 2, 3), keepdims=True)
    std = jnp.sqrt(jnp.mean((x - mean) ** 2, axis=(1, 2, 3), keepdims=True) + eps)
    normalized = (x - mean) / std
    out = normalized * weight + bias
    C = x.shape[1]
    rescale = m1w.reshape(1, C, 1, 1) * std + m1b.reshape(1, C, 1, 1)
    rebias = m2w.reshape(1, C, 1, 1) * mean + m2b.reshape(1, C, 1, 1)
    return out, rescale, rebias


if __name__ == "__main__":
    N, C, H, W = 2, 4, 16, 16
    dim = C
    eps = 1e-5

    key = jax.random.PRNGKey(0)
    k_x, k_m1, k_m2 = jax.random.split(key, 3)

    x = jax.random.normal(k_x, (N, C, H, W), dtype=jnp.float32)

    # Deterministic parameter init mirroring the PyTorch __init__:
    weight = jnp.ones((1, dim, 1, 1), dtype=jnp.float32)
    bias = jnp.zeros((1, dim, 1, 1), dtype=jnp.float32)
    meta1_w = 0.02 * jax.random.truncated_normal(k_m1, -2.0, 2.0, (dim, 1, 1, 1), jnp.float32)
    meta1_b = jnp.ones((dim,), dtype=jnp.float32)      # constant_(bias, 1)
    meta2_w = 0.02 * jax.random.truncated_normal(k_m2, -2.0, 2.0, (dim, 1, 1, 1), jnp.float32)
    meta2_b = jnp.zeros((dim,), dtype=jnp.float32)     # constant_(bias, 0)

    out, rescale, rebias = rln_forward(
        x, weight, bias, meta1_w, meta1_b, meta2_w, meta2_b, eps=eps)
    jax.block_until_ready((out, rescale, rebias))

    # Cross-check against a pure-JAX reference.
    out_r, rescale_r, rebias_r = _reference(
        x, weight, bias, meta1_w, meta1_b, meta2_w, meta2_b, eps=eps)
    assert jnp.allclose(out, out_r, atol=1e-5, rtol=1e-5)
    assert jnp.allclose(rescale, rescale_r, atol=1e-5, rtol=1e-5)
    assert jnp.allclose(rebias, rebias_r, atol=1e-5, rtol=1e-5)

    print("KERNEL_OK")
</pallas_src>

<mosaic_0001>
module attributes {stable_mosaic.version = 11 : i64} {
  func.func @_rln_kernel(%arg0: i32, %arg1: memref<1x4x256xf32, #tpu.memory_space<vmem>>, %arg2: memref<2x4x1xf32, #tpu.memory_space<vmem>>, %arg3: memref<1x4x256xf32, #tpu.memory_space<vmem>>, %arg4: memref<1x1x1xf32, #tpu.memory_space<vmem>>, %arg5: memref<1x1x1xf32, #tpu.memory_space<vmem>>) attributes {dimension_semantics = [#tpu.dimension_semantics<parallel>], iteration_bounds = array<i64: 2>, scalar_prefetch = 0 : i64, scratch_operands = 0 : i64, tpu.core_type = #tpu.core_type<tc>, window_params = [{transform_indices = @transform_0, window_bounds = array<i64: 1, 4, 256>}, {pipeline_mode = #tpu.pipeline_mode<synchronous>, transform_indices = @transform_1, window_bounds = array<i64: 2, 4, 1>}, {transform_indices = @transform_2, window_bounds = array<i64: 1, 4, 256>}, {transform_indices = @transform_3, window_bounds = array<i64: 1, 1, 1>}, {transform_indices = @transform_4, window_bounds = array<i64: 1, 1, 1>}]} {
    %c0 = arith.constant 0 : index
    %c0_0 = arith.constant 0 : index
    %c0_1 = arith.constant 0 : index
    %0 = vector.load %arg1[%c0, %c0_0, %c0_1] : memref<1x4x256xf32, #tpu.memory_space<vmem>>, vector<1x4x256xf32>
    %1 = vector.shape_cast %0 : vector<1x4x256xf32> to vector<4x256xf32>
    %2 = vector.shape_cast %1 : vector<4x256xf32> to vector<1x4x256xf32>
    %cst = arith.constant dense<0.000000e+00> : vector<1xf32>
    %3 = vector.multi_reduction <add>, %2, %cst [1, 2] : vector<1x4x256xf32> to vector<1xf32>
    %4 = vector.shape_cast %3 : vector<1xf32> to vector<1x1x1xf32>
    %5 = vector.extract %4[0, 0, 0] : f32 from vector<1x1x1xf32>
    %6 = arith.mulf %1, %1 : vector<4x256xf32>
    %7 = vector.shape_cast %6 : vector<4x256xf32> to vector<1x4x256xf32>
    %cst_2 = arith.constant dense<0.000000e+00> : vector<1xf32>
    %8 = vector.multi_reduction <add>, %7, %cst_2 [1, 2] : vector<1x4x256xf32> to vector<1xf32>
    %9 = vector.shape_cast %8 : vector<1xf32> to vector<1x1x1xf32>
    %10 = vector.extract %9[0, 0, 0] : f32 from vector<1x1x1xf32>
    %cst_3 = arith.constant 9.765625E-4 : f32
    %11 = arith.mulf %5, %cst_3 : f32
    %cst_4 = arith.constant 9.765625E-4 : f32
    %12 = arith.mulf %10, %cst_4 : f32
    %13 = arith.mulf %11, %11 : f32
    %14 = arith.subf %12, %13 : f32
    %cst_5 = arith.constant 0.000000e+00 : f32
    %15 = arith.maximumf %14, %cst_5 : f32
    %cst_6 = arith.constant 9.99999974E-6 : f32
    %16 = arith.addf %15, %cst_6 : f32
    %17 = math.rsqrt %16 : f32
    %cst_7 = arith.constant 9.99999974E-6 : f32
    %18 = arith.addf %15, %cst_7 : f32
    %19 = math.sqrt %18 : f32
    %c0_8 = arith.constant 0 : index
    %c0_9 = arith.constant 0 : index
    %c0_10 = arith.constant 0 : index
    %20 = vector.load %arg2[%c0_8, %c0_9, %c0_10] : memref<2x4x1xf32, #tpu.memory_space<vmem>>, vector<1x4x1xf32>
    %21 = vector.shape_cast %20 : vector<1x4x1xf32> to vector<4x1xf32>
    %c1 = arith.constant 1 : index
    %c0_11 = arith.constant 0 : index
    %c0_12 = arith.constant 0 : index
    %22 = vector.load %arg2[%c1, %c0_11, %c0_12] : memref<2x4x1xf32, #tpu.memory_space<vmem>>, vector<1x4x1xf32>
    %23 = vector.shape_cast %22 : vector<1x4x1xf32> to vector<4x1xf32>
    %24 = vector.broadcast %11 : f32 to vector<4x256xf32>
    %25 = arith.subf %1, %24 : vector<4x256xf32>
    %26 = vector.broadcast %17 : f32 to vector<4x256xf32>
    %27 = arith.mulf %25, %26 : vector<4x256xf32>
    %28 = vector.broadcast %21 : vector<4x1xf32> to vector<4x256xf32>
    %29 = arith.mulf %27, %28 : vector<4x256xf32>
    %30 = vector.broadcast %23 : vector<4x1xf32> to vector<4x256xf32>
    %31 = arith.addf %29, %30 : vector<4x256xf32>
    %c0_13 = arith.constant 0 : index
    %c0_14 = arith.constant 0 : index
    %c0_15 = arith.constant 0 : index
    %32 = vector.load %arg3[%c0_13, %c0_14, %c0_15] : memref<1x4x256xf32, #tpu.memory_space<vmem>>, vector<1x4x256xf32>
    %33 = vector.shape_cast %32 : vector<1x4x256xf32> to vector<4x256xf32>
    %34 = vector.shape_cast %31 : vector<4x256xf32> to vector<1x4x256xf32>
    tpu.vector_store %arg3[%c0_13, %c0_14, %c0_15], %34 {strides = array<i32>} : memref<1x4x256xf32, #tpu.memory_space<vmem>>, vector<1x4x256xf32>,
    %35 = vector.broadcast %11 : f32 to vector<1x1xf32>
    %c0_16 = arith.constant 0 : index
    %c0_17 = arith.constant 0 : index
    %c0_18 = arith.constant 0 : index
    %36 = vector.load %arg4[%c0_16, %c0_17, %c0_18] : memref<1x1x1xf32, #tpu.memory_space<vmem>>, vector<1x1x1xf32>
    %37 = vector.shape_cast %36 : vector<1x1x1xf32> to vector<1x1xf32>
    %38 = vector.shape_cast %35 : vector<1x1xf32> to vector<1x1x1xf32>
    tpu.vector_store %arg4[%c0_16, %c0_17, %c0_18], %38 {strides = array<i32>} : memref<1x1x1xf32, #tpu.memory_space<vmem>>, vector<1x1x1xf32>,
    %39 = vector.broadcast %19 : f32 to vector<1x1xf32>
    %c0_19 = arith.constant 0 : index
    %c0_20 = arith.constant 0 : index
    %c0_21 = arith.constant 0 : index
    %40 = vector.load %arg5[%c0_19, %c0_20, %c0_21] : memref<1x1x1xf32, #tpu.memory_space<vmem>>, vector<1x1x1xf32>
    %41 = vector.shape_cast %40 : vector<1x1x1xf32> to vector<1x1xf32>
    %42 = vector.shape_cast %39 : vector<1x1xf32> to vector<1x1x1xf32>
    tpu.vector_store %arg5[%c0_19, %c0_20, %c0_21], %42 {strides = array<i32>} : memref<1x1x1xf32, #tpu.memory_space<vmem>>, vector<1x1x1xf32>,
    return
  }
  func.func @transform_0(%arg0: i32) -> (i32, i32, i32) {
    %c0_i32 = arith.constant 0 : i32
    %c0_i32_0 = arith.constant 0 : i32
    %c0_i32_1 = arith.constant 0 : i32
    return %arg0, %c0_i32, %c0_i32_0 : i32, i32, i32
  }
  func.func @transform_1(%arg0: i32) -> (i32, i32, i32) {
    %c0_i32 = arith.constant 0 : i32
    %c0_i32_0 = arith.constant 0 : i32
    %c0_i32_1 = arith.constant 0 : i32
    %c0_i32_2 = arith.constant 0 : i32
    return %c0_i32, %c0_i32_0, %c0_i32_1 : i32, i32, i32
  }
  func.func @transform_2(%arg0: i32) -> (i32, i32, i32) {
    %c0_i32 = arith.constant 0 : i32
    %c0_i32_0 = arith.constant 0 : i32
    %c0_i32_1 = arith.constant 0 : i32
    return %arg0, %c0_i32, %c0_i32_0 : i32, i32, i32
  }
  func.func @transform_3(%arg0: i32) -> (i32, i32, i32) {
    %c0_i32 = arith.constant 0 : i32
    %c0_i32_0 = arith.constant 0 : i32
    %c0_i32_1 = arith.constant 0 : i32
    return %arg0, %c0_i32, %c0_i32_0 : i32, i32, i32
  }
  func.func @transform_4(%arg0: i32) -> (i32, i32, i32) {
    %c0_i32 = arith.constant 0 : i32
    %c0_i32_0 = arith.constant 0 : i32
    %c0_i32_1 = arith.constant 0 : i32
    return %arg0, %c0_i32, %c0_i32_0 : i32, i32, i32
  }
}

</mosaic_0001>

<bundles_post_ra>
// kernel: tpu_custom_call.1
= control target key start
LH: loop header
LB: loop body
LE: loop exit
PB: predicated region body
PF: predicated region fallthrough
CT: control target
= control target key end

     0   :  { %10 = vsyncpa [#allocation3], 0  ;;  %s855_s0 = inlined_call_operand.hbm [shape: f32[2,4,256], index: 0, kind: input, shape index: {}]   ;;  %s856_s1 = inlined_call_operand.vmem [shape: f32[2,4,1], index: 1, kind: input, shape index: {}]   ;;  %s857_s2 = inlined_call_operand.hbm [shape: f32[2,4,256], index: 2, kind: output, shape index: {0}]   ;;  %s858_s3 = inlined_call_operand.vmem [shape: f32[2,1,1], index: 3, kind: output, shape index: {1}]   ;;  %s859_s4 = inlined_call_operand.vmem [shape: f32[2,1,1], index: 4, kind: output, shape index: {2}]  }
   0x1   :  { %12 = vsyncpa [#allocation3 + $0x1], 0 }
   0x2   :  { %13 = vsyncpa [#allocation4], 0 }
   0x3   :  { %15 = vsyncpa [#allocation4 + $0x1], 0  ;;  %s662_s15 = smov 0   ;;  %s664_s16 = smov 0  }
   0x4   :  { %s666_s17 = smov 0   ;;  %s668_s18 = smov 0  }
   0x5 LB: > { %s683_s19 = sadd.s32 4294967295, %s630_s18   ;;  %s455_s20 = sadd.s32 4294967294, %s630_s18   ;;  %s630_s18 = sphi %s668_s18, %s874_s18   ;;  %s626_s17 = sphi %s666_s17, %s873_s17   ;;  %s622_s16 = sphi %s664_s16, %s872_s16   ;;  %s618_s15 = sphi %s662_s15, %s871_s15  }
   0x6   : > { %s687_s21 = sadd.s32 1, %s630_s18   ;;  %s28_s22 = sadd.s32 1, %s626_s17 }
   0x7   : > { %s25_s23 = ssub.s32 %s630_s18, %s687_s21  ;;  %p35_p0 = scmp.ne.s32.totalorder %s626_s17, %s622_s16 }
   0x8   : > { %p26_p1 = scmp.eq.s32.totalorder %s25_s23, 0  ;;  %p36_p2 = scmp.eq.s32.totalorder %s630_s18, 0 }
   0x9   : > { %p41_p3 = scmp.ne.s32.totalorder %s622_s16, %s618_s15  ;;  %p42_p4 = scmp.eq.s32.totalorder %s683_s19, 0 }
   0xa   : > { %s699_s24 = scalar_select %p26_p1, %s626_s17, %s28_s22  }
   0xb   : > { %p701_p5 = por %p36_p2, %p35_p0  ;;  %p705_p6 = por %p42_p4, %p41_p3 }
   0xc   : > { %p86_p7 = scmp.eq.s32.totalorder %s683_s19, 1  ;;  %p92_p8 = scmp.eq.s32.totalorder %s455_s20, 1 }
   0xd   : > { %p492_p10 = scmp.lt.s32.totalorder %s630_s18, 2  ;;  %s167_s29 = sand.u32 1, %s626_s17  }
   0xe   : > { %p712_p11 = por %p86_p7, %p35_p0  ;;  %p716_p12 = por %p92_p8, %p41_p3 }
   0xf   : > { %s470_s30 = sshll.u32 %s630_s18, 7  ;;  %s458_s5 = sshll.u32 %s167_s29, 3 }
  0x10   : > { %s863_s27 = scalar_select %p712_p11, 1, 0 }
  0x11   : > { %s864_s28 = scalar_select %p716_p12, 1, 0 }
  0x12   : > { %s725_s8 = scalar_lea.hbm %s855_s0, %s470_s30  ;;  %s171_s9 = scalar_lea.vmem [#allocation2], %s458_s5 }
  0x13   : > { %s179_s10 = sshll.u32 %s171_s9, 4  ;;  %p729_p13 = pnand %p492_p10, %p701_p5  ;;  %s733_s10 = int_to_ptr.vmem [resolvable:$true] %s179_s10 }
  0x14   : > { %s168_s12 = scalar_lea.sflag [#allocation3], %s167_s29  ;;  %s534_s13 = scalar_lea.hbm %s725_s8, 128 }
  0x15   : > { %p535_p2 = scmp.ne.s32.totalorder %s725_s8, %s534_s13  ;;  %p536_p3 = pneg %p729_p13 }
  0x16   : > { %s539_s22 = scalar_lea.hbm %s855_s0, 256  ;;  %p540_p5 = scmp.lt.u32.totalorder %s725_s8, %s855_s0 }
  0x17   : > { %p537_p4 = pnand %p536_p3, %p535_p2  ;;  %p541_p8 = scmp.lt.u32.totalorder %s539_s22, %s534_s13 }
  0x18   : > { %p543_p9 = scmp.lt.u32.totalorder %s534_s13, %s725_s8 }
  0x19   : > { %p538_p7 = pneg %p537_p4  ;;  %p542_p10 = por %p541_p8, %p540_p5 }
  0x1b   : > { %p544_p0 = por %p543_p9, %p542_p10 }
  0x1d   : > { %p545_p1 = pnand %p544_p0, %p538_p7 }
  0x1f   : > { %548 = shalt.err (!%p545_p1)
}
  0x20   : > { %s549_s29 = scalar_lea.vmem %s733_s10, 128  ;;  %s632_s30 = smov [#allocation2]  }
  0x21   : > { %p550_p2 = scmp.ne.s32.totalorder %s733_s10, %s549_s29  ;;  %s554_s5 = sshll.u32 %s632_s30, 4  ;;  %s555_s5 = int_to_ptr.vmem [resolvable:$false] %s554_s5 }
  0x22   : > { %s556_s6 = scalar_lea.vmem %s555_s5, 256  ;;  %p557_p11 = scmp.lt.s32.totalorder %s733_s10, %s555_s5 }
  0x23   : > { %p552_p4 = pnand %p550_p2, %p536_p3  ;;  %p558_p5 = scmp.lt.s32.totalorder %s556_s6, %s549_s29 }
  0x25   : > { %p553_p12 = pneg %p552_p4  ;;  %p559_p8 = por %p558_p5, %p557_p11 }
  0x27   : > { %p560_p9 = pnand %p559_p8, %p553_p12 }
  0x29   : > { %563 = shalt.err (!%p560_p9)
}
  0x2a   : > { %487 = dma.hbm_to_vmem [thread:$0]  (!%p729_p13), %s725_s8, 128, %s733_s10, %s168_s12  }
  0x2b   : > { %p866_p0 = scmp.lt.s32.totalorder %s630_s18, 3  ;;  %p867_p1 = scmp.ge.s32.totalorder %s630_s18, 1 }
  0x2d   : > { %p185_p3 = pnand %p867_p1, %p866_p0 }
  0x2e   : > { %s767_s7 = sand.u32 (!%p185_p3), 1, %s622_s16  }
  0x2f   : > { %188 = sbr.rel (%p185_p3) target bundleno = 359 (0x167), region = 28  ;;  %s462_s9 = sshll.u32 (!%p185_p3), %s767_s7, 3 }
  0x30   : > { %s191_s13 = scalar_lea.sflag (!%p185_p3), [#allocation3], %s767_s7  ;;  %s194_s11 = scalar_lea.vmem (!%p185_p3), [#allocation2], %s462_s9 }
  0x36   : > { %609 = dma.done.wait (%p705_p6), %s191_s13, 128  }
  0x37   : > { %611 = vsyncadd (%p705_p6), %s191_s13, 4294967168  ;;  %vm235_vm0 = vcmask 1043456   ;;  %v777_v0 = vld [vmem:[%s194_s11] sm:$0xff]  ;;  %v633_v10 = vmov 0   ;;  %p225_p6 = scmp.lt.s32.totalorder %s683_s19, 1  ;;  %vm316_vm1 = vcmask 0   ;;  %v296_v36 = vlaneseq }
  0x38   : > { %v233_v1 = vcombine.high %v777_v0, %v777_v0  ;;  %v236_v2 = vsel %vm235_vm0, %v777_v0, 0.0  ;;  %v248_v3 = vmul.f32 %v777_v0, %v777_v0  ;;  %529 = vset.pattern.permute.xlu1 %v633_v10  ;;  %v282_v11 = vld [vmem:[%s856_s1] sm:$0xf]  ;;  %530 = vset.pattern.permute.xlu0 %v633_v10  ;;  %v464_v12 = vld [vmem:[%s856_s1 + $0x4] sm:$0xf]  ;;  %s634_s11 = smov 0.0  }
  0x39   : > { %291 = vperm.xlu1 %529, %v282_v11   ;;  %s792_s14 = scalar_select %p225_p6, %s683_s19, 1  ;;  %v635_v34 = vmov 839922192   ;;  %v297_v38 = vshrl.u32 %v296_v36, 7 }
  0x3a   : > { %v237_v4 = vsel %vm235_vm0, %v233_v1, 0.0  ;;  %v250_v5 = vcombine.high %v248_v3, %v248_v3  ;;  %v252_v6 = vsel %vm235_vm0, %v248_v3, 0.0  ;;  %v294_v35 = vunpack.c.l.s4 %v635_v34  ;;  %s471_s23 = sshll.u32 %s683_s19, 7  ;;  %s321_s19 = scalar_lea.sflag [#allocation4], %s767_s7 }
  0x3b   : > { %v238_v7 = vadd.f32 %v237_v4, %v236_v2  ;;  %s227_s25 = scalar_lea.vmem %s858_s3, %s792_s14  ;;  %s230_s22 = scalar_lea.vmem %s859_s4, %s792_s14 }
  0x3c   : > { %v253_v8 = vsel %vm235_vm0, %v250_v5, 0.0  ;;  %v295_v37 = vunpack.c.0.s8 %v294_v35  ;;  %p868_p12 = scmp.ne.s32.totalorder %s863_s27, 0  ;;  %s636_s14 = smov [#allocation5]  }
  0x3d   : > { %239 = vadd.xlane.f32.xlu0 %v238_v7  ;;  %v254_v9 = vadd.f32 %v253_v8, %v252_v6  ;;  %304 = vperm.xlu1 %529, %v464_v12  }
  0x3e   : > { %v298_v40 = vsub.s32 %v295_v37, %v297_v38 }
  0x41   : > { %255 = vadd.xlane.f32.xlu0 %v254_v9 }
  0xb8   : > { %v292_v39 = vpop.permute.xlu1 %291 }
  0xb9   : > { %v299_v44 = vrot.slane %v292_v39, %v298_v40 }
  0xbc   : > { %v305_v42 = vpop.permute.xlu1 %304 }
  0xbd   : > { %v312_v46 = vrot.slane %v305_v42, %v298_v40 }
  0xca   : > { %v240_v13 = vpop.xlane.xlu0 %239 }
  0xcb   : > { %v241_v14 = vrot.slane %v240_v13, 4 }
  0xcd   : > { %v242_v15 = vadd.f32 %v241_v14, %v240_v13 }
  0xce   : > { %v256_v16 = vpop.xlane.xlu0 %255 }
  0xcf   : > { %v243_v17 = vrot.slane %v242_v15, 2  ;;  %v257_v18 = vrot.slane %v256_v16, 4 }
  0xd1   : > { %v258_v19 = vadd.f32 %v257_v18, %v256_v16  ;;  %v244_v20 = vadd.f32 %v243_v17, %v242_v15 }
  0xd3   : > { %v259_v21 = vrot.slane %v258_v19, 2  ;;  %v245_v22 = vrot.slane %v244_v20, 1 }
  0xd5   : > { %v260_v23 = vadd.f32 %v259_v21, %v258_v19  ;;  %v246_v24 = vadd.f32 %v245_v22, %v244_v20 }
  0xd7   : > { %472 = vpush %v246_v24  ;;  %v261_v25 = vrot.slane %v260_v23, 1 }
  0xd9   : > { %v262_v26 = vadd.f32 %v261_v25, %v260_v23 }
  0xdb   : > { %474 = vpush %v262_v26 }
 0x108   : > { %s473_s20 = spop %472 }
 0x109   : > { %s264_s29 = smul.f32 0.0009765625, %s473_s20 }
 0x10b   : > { %v285_v27 = vstv %s264_s29  ;;  %s266_s30 = smul.f32 %s264_s29, %s264_s29 }
 0x10c   : > { %317 = vst.msk [vmem:[%s227_s25] sm:$0x1] %vm316_vm1, %v285_v27  ;;  %s475_s5 = spop %474  ;;  %v286_v41 = vsub.f32 %v777_v0, %v285_v27  ;;  %s214_s25 = scalar_lea.vmem [#allocation5], %s462_s9 }
 0x10d   : > { %s265_s6 = smul.f32 0.0009765625, %s475_s5  ;;  %s341_s29 = sshll.u32 %s214_s25, 4  ;;  %s813_s29 = int_to_ptr.vmem [resolvable:$true] %s341_s29 }
 0x10e   : > { %s564_s9 = scalar_lea.vmem %s813_s29, 128 }
 0x10f   : > { %s267_s13 = ssub.f32 %s265_s6, %s266_s30  ;;  %p565_p11 = scmp.ne.s32.totalorder %s813_s29, %s564_s9 }
 0x111   : > { %s268_s26 = smax.f32 %s634_s11, %s267_s13  ;;  %s811_s13 = scalar_lea.hbm %s857_s2, %s471_s23 }
 0x112   : > { %s269_s8 = sadd.f32 1e-05, %s268_s26  ;;  %p566_p13 = pnand %p565_p11, %p868_p12 }
 0x113   : > { %s568_s11 = sshll.u32 %s636_s14, 4  ;;  %s569_s11 = int_to_ptr.vmem [resolvable:$false] %s568_s11 }
 0x114   : > { %v270_v28 = vstv %s269_s8  ;;  %p567_p7 = pneg %p566_p13  ;;  %s570_s26 = scalar_lea.vmem %s569_s11, 256 }
 0x115   : > { %532 = vrsqrt.f32 %v270_v28  ;;  %vm276_vm2 = vcmp.eq.f32.partialorder %v270_v28, inf  ;;  %v279_v31 = vand.u32 2147483648, %v270_v28  ;;  %vm278_vm3 = vcmp.eq.f32.partialorder %v270_v28, 0.0  ;;  %p571_p10 = scmp.lt.s32.totalorder %s813_s29, %s569_s11  ;;  %p572_p2 = scmp.lt.s32.totalorder %s570_s26, %s564_s9 }
 0x117   : > { %p573_p4 = por %p572_p2, %p571_p10 }
 0x119   : > { %p574_p5 = pnand %p573_p4, %p567_p7 }
 0x11f   : > { %v533_v29 = vpop.eup %532 }
 0x120   : > { %476 = vpush %v533_v29  ;;  %v275_v30 = vmul.f32 %v533_v29, %v270_v28 }
 0x122   : > { %v277_v32 = vsel %vm276_vm2, %v270_v28, %v275_v30 }
 0x123   : > { %v280_v33 = vsel %vm278_vm3, %v279_v31, %v277_v32 }
 0x124   : > { %478 = vpush %v280_v33 }
 0x151   : > { %s477_s10 = spop %476 }
 0x152   : > { %v287_v43 = vstv %s477_s10 }
 0x153   : > { %v288_v45 = vmul.f32 %v287_v43, %v286_v41 }
 0x155   : > { %v301_v47 = vmul.f32 %v299_v44, %v288_v45  ;;  %s479_s30 = spop %478 }
 0x156   : > { %v318_v48 = vstv %s479_s30 }
 0x157   : > { %v314_v49 = vadd.f32 %v312_v46, %v301_v47  ;;  %319 = vst.msk [vmem:[%s230_s22] sm:$0x1] %vm316_vm1, %v318_v48 }
 0x159   : > { %315 = vst [vmem:[%s214_s25] sm:$0xff] %v314_v49 }
 0x15a   : > { %577 = shalt.err (!%p574_p5)
}
 0x15b   : > { %s578_s7 = scalar_lea.hbm %s811_s13, 128  ;;  %s582_s12 = scalar_lea.hbm %s857_s2, 256 }
 0x15c   : > { %p579_p8 = scmp.ne.s32.totalorder %s811_s13, %s578_s7  ;;  %p583_p1 = scmp.lt.u32.totalorder %s811_s13, %s857_s2 }
 0x15d   : > { %p584_p3 = scmp.lt.u32.totalorder %s582_s12, %s578_s7  ;;  %p586_p11 = scmp.lt.u32.totalorder %s578_s7, %s811_s13 }
 0x15e   : > { %p580_p9 = pnand %p579_p8, %p868_p12 }
 0x15f   : > { %p585_p6 = por %p584_p3, %p583_p1 }
 0x160   : > { %p581_p0 = pneg %p580_p9 }
 0x161   : > { %p587_p13 = por %p586_p11, %p585_p6 }
 0x163   : > { %p588_p7 = pnand %p587_p13, %p581_p0 }
 0x165   : > { %591 = shalt.err (!%p588_p7)
}
 0x166   : > { %482 = dma.vmem_to_hbm [thread:$0]  (%p868_p12), %s813_s29, 128, %s811_s13, %s321_s19  }
 0x167 PF: > { %s359_s23 = sand.u32 1, %s618_s15   ;;  %p869_p10 = scmp.ne.s32.totalorder %s864_s28, 0 }
 0x168   : > { %p870_p2 = scmp.ge.s32.totalorder %s630_s18, 2  ;;  %s360_s25 = scalar_lea.sflag [#allocation4], %s359_s23 }
 0x16a   : > { %p489_p4 = pnand %p870_p2, %p869_p10 }
 0x16c   : > { %613 = dma.done.wait (!%p489_p4), %s360_s25, 128  }
 0x16d   : > { %615 = vsyncadd (!%p489_p4), %s360_s25, 4294967168  ;;  %p18_p5 = scmp.ge.s32.totalorder %s687_s21, 4   ;;  %s871_s15 = smov %s622_s16 }
 0x16e   : > { %s872_s16 = smov %s626_s17  ;;  %s873_s17 = smov %s699_s24 }
 0x16f   : > { %s874_s18 = smov %s687_s21  ;;  %20 = sbr.rel (!%p18_p5) target bundleno = 5 (0x5), region = 98 }
 0x176   :  { %377 = vsyncpa [#allocation3], 1 }
 0x177   :  { %379 = vsyncpa [#allocation3 + $0x1], 1 }
 0x178   :  { %380 = vsyncpa [#allocation4], 1 }
 0x179   :  { %382 = vsyncpa [#allocation4 + $0x1], 1 }

</bundles_post_ra>
